<compile_context>
chip_gen: v7x
topology: tpu7x:2x2x1
jax: 0.10.0
libtpu: 0.0.40
codegen_flags: <defaults>
</compile_context>

<pallas_src>
import functools

import jax
import jax.numpy as jnp
from jax.experimental import pallas as pl
from jax.experimental.pallas import tpu as pltpu


def _round_up(a: int, m: int) -> int:
    return ((a + m - 1) // m) * m


# ----------------------------- Pallas kernels -------------------------------

def _gate_kernel(x_ref, wg1t_ref, bg1_ref, wg2t_ref, bg2_ref, s_ref):
    # x_ref: (tm, Dp) bf16; wg1t: (Dp, H) bf16; wg2t: (H, H) bf16
    # bg1/bg2: (1, H) f32; s_ref: (tm, H) f32
    x = x_ref[...]
    g1 = jnp.dot(x, wg1t_ref[...], preferred_element_type=jnp.float32) + bg1_ref[...]
    g1 = jnp.maximum(g1, 0.0)                                          # ReLU (f32)
    s_ref[...] = (jnp.dot(g1.astype(jnp.bfloat16), wg2t_ref[...],
                          preferred_element_type=jnp.float32) + bg2_ref[...])


def _upmod_select_down_kernel(x_ref, sel_ref, wumt_ref, bup_ref, bmod_ref,
                              wdownt_ref, bdown_ref, o_ref):
    # x_ref: (Bt, S, Dp) bf16; sel: (Bt, 1, H) f32
    # wumt: (Dp, 2H) bf16 == [w_up^T | w_mod^T]; bup/bmod: (1, H) f32
    # wdownt: (H, Dp) bf16; bdown: (1, Dp) f32; o_ref: (Bt, S, Dp) f32
    Bt, S, Dp = x_ref.shape
    H = bup_ref.shape[-1]

    x2 = x_ref[...].reshape(Bt * S, Dp)                                # bf16 rows
    # single concatenated up|mod projection: one MXU weight stream
    hum = jnp.dot(x2, wumt_ref[...], preferred_element_type=jnp.float32)  # (Bt*S, 2H)
    h_up = hum[:, :H].reshape(Bt, S, H)
    h_mod = hum[:, H:].reshape(Bt, S, H)

    pick = sel_ref[...] > 0.5                                          # (Bt, 1, H)
    h = jnp.where(pick, h_mod, h_up)                                   # activation select
    h = h + jnp.where(pick, bmod_ref[...][None], bup_ref[...][None])   # bias select
    h = jax.nn.gelu(h, approximate=True)                               # tanh GELU
    # dropout: identity (inference / eval mode)

    out = (jnp.dot(h.reshape(Bt * S, H).astype(jnp.bfloat16), wdownt_ref[...],
                   preferred_element_type=jnp.float32) + bdown_ref[...])
    o_ref[...] = out.reshape(Bt, S, Dp)


# ------------------------- one-time weight preparation -----------------------

def prepare_params(params):
    """Transpose to [in, out], lane-pad D -> Dp (multiple of 128), cast matmul
    operands to bf16.  Runs once, OUTSIDE the jitted forward."""
    f32, bf16 = jnp.float32, jnp.bfloat16
    H, D = params["w_up"].shape
    Dp = _round_up(D, 128)

    def pad_in_t(w):          # (H, D) nn.Linear weight -> (Dp, H) bf16
        return jnp.pad(w.T, ((0, Dp - D), (0, 0))).astype(bf16)

    return dict(
        wg1t=pad_in_t(params["w_g1"]),                                   # (Dp, H)
        bg1=params["b_g1"].reshape(1, H).astype(f32),
        wg2t=params["w_g2"].T.astype(bf16),                              # (H, H)
        bg2=params["b_g2"].reshape(1, H).astype(f32),
        wumt=jnp.concatenate([pad_in_t(params["w_up"]),
                              pad_in_t(params["w_mod"])], axis=1),       # (Dp, 2H)
        bup=params["b_up"].reshape(1, H).astype(f32),
        bmod=params["b_mod"].reshape(1, H).astype(f32),
        wdownt=jnp.pad(params["w_down"].T, ((0, 0), (0, Dp - D))).astype(bf16),  # (H, Dp)
        bdown=jnp.pad(params["b_down"], (0, Dp - D)).reshape(1, Dp).astype(f32),
    )


# ------------------------------ JAX wrapper ---------------------------------

@functools.partial(jax.jit, static_argnames=("top_k",))
def praxis_scatter_forward(x, prepped, *, top_k):
    B, S, D = x.shape
    H = prepped["bup"].shape[-1]
    Dp = prepped["wg1t"].shape[0]
    M = B * S
    f32, bf16 = jnp.float32, jnp.bfloat16

    # lane-pad the feature dim once; reused by both kernels
    x3p = jnp.pad(x, ((0, 0), (0, 0), (0, Dp - D))).astype(bf16)         # (B, S, Dp)

    # grid-invariant operands need no double buffering
    invariant = dict(pipeline_mode=pl.Buffered(1))

    # ---- kernel 1: gate scores over row tiles of M = B*S rows ----
    # One MXU-shaped tile when M is small; 256-row tiles otherwise.
    tm = _round_up(M, 16) if M <= 256 else 256
    Mp = _round_up(M, tm)
    grid1 = Mp // tm
    x2p = x3p.reshape(M, Dp)
    if Mp != M:
        x2p = jnp.pad(x2p, ((0, Mp - M), (0, 0)))

    ce1 = pl.CostEstimate(
        flops=2 * Mp * Dp * H + 2 * Mp * H * H,
        transcendentals=0,
        bytes_accessed=(Mp * Dp * 2 + (Dp * H + H * H) * 2 + 2 * H * 4 + Mp * H * 4),
    )
    scores = pl.pallas_call(
        _gate_kernel,
        out_shape=jax.ShapeDtypeStruct((Mp, H), f32),
        grid=(grid1,),
        in_specs=[
            pl.BlockSpec((tm, Dp), lambda i: (i, 0)),
            pl.BlockSpec((Dp, H), lambda i: (0, 0), **invariant),
            pl.BlockSpec((1, H), lambda i: (0, 0), **invariant),
            pl.BlockSpec((H, H), lambda i: (0, 0), **invariant),
            pl.BlockSpec((1, H), lambda i: (0, 0), **invariant),
        ],
        out_specs=pl.BlockSpec((tm, H), lambda i: (i, 0)),
        compiler_params=pltpu.CompilerParams(dimension_semantics=("parallel",)),
        cost_estimate=ce1,
    )(x2p, prepped["wg1t"], prepped["bg1"], prepped["wg2t"], prepped["bg2"])

    # ---- top-k over flattened (seq * hidden) scores -> per-batch hidden mask ----
    flat_scores = scores[:M].reshape(B, S * H)
    k = min(top_k * S, S * H)
    _, flat_idx = jax.lax.top_k(flat_scores, k)                          # (B, k)
    hid_idx = flat_idx % H
    # broadcast-compare mask (fine at small H; duplicates collapse via any())
    sel = jnp.any(hid_idx[:, :, None] == jnp.arange(H)[None, None, :], axis=1)
    sel = sel.astype(f32).reshape(B, 1, H)                               # (B, 1, H)

    # ---- kernel 2: up/mod projections + select + GELU + down, batch-blocked ----
    Bt = max(1, min(B, 256 // max(S, 1)))     # Bt*S rows per step ~= 256
    grid2 = pl.cdiv(B, Bt)
    Bpad = grid2 * Bt
    if Bpad != B:
        x3p = jnp.pad(x3p, ((0, Bpad - B), (0, 0), (0, 0)))
        sel = jnp.pad(sel, ((0, Bpad - B), (0, 0), (0, 0)))

    ce2 = pl.CostEstimate(
        flops=2 * Bpad * S * Dp * (2 * H) + 2 * Bpad * S * H * Dp + 20 * Bpad * S * H,
        transcendentals=Bpad * S * H,
        bytes_accessed=(Bpad * S * Dp * 2 + Bpad * H * 4 + 2 * H * 4
                        + (Dp * 2 * H + H * Dp) * 2 + Dp * 4 + Bpad * S * Dp * 4),
    )
    out_padded = pl.pallas_call(
        _upmod_select_down_kernel,
        out_shape=jax.ShapeDtypeStruct((Bpad, S, Dp), f32),
        grid=(grid2,),
        in_specs=[
            pl.BlockSpec((Bt, S, Dp), lambda b: (b, 0, 0)),
            pl.BlockSpec((Bt, 1, H), lambda b: (b, 0, 0)),
            pl.BlockSpec((Dp, 2 * H), lambda b: (0, 0), **invariant),
            pl.BlockSpec((1, H), lambda b: (0, 0), **invariant),
            pl.BlockSpec((1, H), lambda b: (0, 0), **invariant),
            pl.BlockSpec((H, Dp), lambda b: (0, 0), **invariant),
            pl.BlockSpec((1, Dp), lambda b: (0, 0), **invariant),
        ],
        out_specs=pl.BlockSpec((Bt, S, Dp), lambda b: (b, 0, 0)),
        compiler_params=pltpu.CompilerParams(dimension_semantics=("parallel",)),
        cost_estimate=ce2,
    )(x3p, sel, prepped["wumt"], prepped["bup"], prepped["bmod"],
      prepped["wdownt"], prepped["bdown"])

    if Bpad != B or Dp != D:
        return out_padded[:B, :, :D]
    return out_padded


# --------------------------- deterministic params ---------------------------

def init_params(key, input_dim, hidden_dim):
    def linear(k, fan_in, fan_out):
        kw, kb = jax.random.split(k)
        bound = 1.0 / (fan_in ** 0.5)
        w = jax.random.uniform(kw, (fan_out, fan_in), jnp.float32, -bound, bound)
        b = jax.random.uniform(kb, (fan_out,), jnp.float32, -bound, bound)
        return w, b

    ks = jax.random.split(key, 5)
    w_up, b_up = linear(ks[0], input_dim, hidden_dim)        # up: Linear(D, H)
    w_down, b_down = linear(ks[1], hidden_dim, input_dim)    # down: Linear(H, D)
    w_mod, b_mod = linear(ks[2], input_dim, hidden_dim)      # mod: Linear(D, H)
    w_g1, b_g1 = linear(ks[3], input_dim, hidden_dim)        # gate[0]: Linear(D, H)
    w_g2, b_g2 = linear(ks[4], hidden_dim, hidden_dim)       # gate[2]: Linear(H, H)
    return dict(w_up=w_up, b_up=b_up, w_down=w_down, b_down=b_down,
                w_mod=w_mod, b_mod=b_mod, w_g1=w_g1, b_g1=b_g1,
                w_g2=w_g2, b_g2=b_g2)


if __name__ == "__main__":
    B, S, D = 2, 8, 32            # batch, seq, hidden_size
    H = 4 * D                     # hidden_dim = 4 * input_dim = 128
    TOP_K = 4                     # keeps selection sparse

    key = jax.random.PRNGKey(0)
    kx, kp = jax.random.split(key)
    x = jax.random.normal(kx, (B, S, D), jnp.float32)
    params = init_params(kp, D, H)
    prepped = prepare_params(params)   # one-time weight transpose/pad/bf16 cast

    out = praxis_scatter_forward(x, prepped, top_k=TOP_K)
    out = jax.block_until_ready(out)
    assert out.shape == (B, S, D) and out.dtype == jnp.float32
    print("KERNEL_OK")
</pallas_src>

<mosaic_0001>
module attributes {stable_mosaic.version = 11 : i64} {
  func.func @_gate_kernel(%arg0: i32, %arg1: memref<16x128xbf16, #tpu.memory_space<vmem>>, %arg2: memref<128x128xbf16, #tpu.memory_space<vmem>>, %arg3: memref<1x128xf32, #tpu.memory_space<vmem>>, %arg4: memref<128x128xbf16, #tpu.memory_space<vmem>>, %arg5: memref<1x128xf32, #tpu.memory_space<vmem>>, %arg6: memref<16x128xf32, #tpu.memory_space<vmem>>) attributes {dimension_semantics = [#tpu.dimension_semantics<parallel>], iteration_bounds = array<i64: 1>, scalar_prefetch = 0 : i64, scratch_operands = 0 : i64, tpu.core_type = #tpu.core_type<tc>, window_params = [{transform_indices = @transform_0, window_bounds = array<i64: 16, 128>}, {pipeline_mode = #tpu.pipeline_mode<synchronous>, transform_indices = @transform_1, window_bounds = array<i64: 128, 128>}, {pipeline_mode = #tpu.pipeline_mode<synchronous>, transform_indices = @transform_2, window_bounds = array<i64: 1, 128>}, {pipeline_mode = #tpu.pipeline_mode<synchronous>, transform_indices = @transform_3, window_bounds = array<i64: 128, 128>}, {pipeline_mode = #tpu.pipeline_mode<synchronous>, transform_indices = @transform_4, window_bounds = array<i64: 1, 128>}, {transform_indices = @transform_5, window_bounds = array<i64: 16, 128>}]} {
    %c0 = arith.constant 0 : index
    %c0_0 = arith.constant 0 : index
    %0 = vector.load %arg1[%c0, %c0_0] : memref<16x128xbf16, #tpu.memory_space<vmem>>, vector<16x128xbf16>
    %c0_1 = arith.constant 0 : index
    %c0_2 = arith.constant 0 : index
    %1 = vector.load %arg2[%c0_1, %c0_2] : memref<128x128xbf16, #tpu.memory_space<vmem>>, vector<128x128xbf16>
    %cst = arith.constant dense<0.000000e+00> : vector<16x128xf32>
    %2 = tpu.matmul %0, %1, %cst {dimension_numbers = #tpu.dot_dimension_numbers<[1], [0], [0], [1], [0, 0, 1, 1], [], []>} : vector<16x128xbf16>, vector<128x128xbf16>, vector<16x128xf32> -> vector<16x128xf32>
    %c0_3 = arith.constant 0 : index
    %c0_4 = arith.constant 0 : index
    %3 = vector.load %arg3[%c0_3, %c0_4] : memref<1x128xf32, #tpu.memory_space<vmem>>, vector<1x128xf32>
    %4 = vector.broadcast %3 : vector<1x128xf32> to vector<16x128xf32>
    %5 = arith.addf %2, %4 : vector<16x128xf32>
    %cst_5 = arith.constant 0.000000e+00 : f32
    %6 = vector.broadcast %cst_5 : f32 to vector<16x128xf32>
    %7 = arith.maximumf %5, %6 : vector<16x128xf32>
    %8 = arith.truncf %7 : vector<16x128xf32> to vector<16x128xbf16>
    %c0_6 = arith.constant 0 : index
    %c0_7 = arith.constant 0 : index
    %9 = vector.load %arg4[%c0_6, %c0_7] : memref<128x128xbf16, #tpu.memory_space<vmem>>, vector<128x128xbf16>
    %cst_8 = arith.constant dense<0.000000e+00> : vector<16x128xf32>
    %10 = tpu.matmul %8, %9, %cst_8 {dimension_numbers = #tpu.dot_dimension_numbers<[1], [0], [0], [1], [0, 0, 1, 1], [], []>} : vector<16x128xbf16>, vector<128x128xbf16>, vector<16x128xf32> -> vector<16x128xf32>
    %c0_9 = arith.constant 0 : index
    %c0_10 = arith.constant 0 : index
    %11 = vector.load %arg5[%c0_9, %c0_10] : memref<1x128xf32, #tpu.memory_space<vmem>>, vector<1x128xf32>
    %12 = vector.broadcast %11 : vector<1x128xf32> to vector<16x128xf32>
    %13 = arith.addf %10, %12 : vector<16x128xf32>
    %c0_11 = arith.constant 0 : index
    %c0_12 = arith.constant 0 : index
    %14 = vector.load %arg6[%c0_11, %c0_12] : memref<16x128xf32, #tpu.memory_space<vmem>>, vector<16x128xf32>
    tpu.vector_store %arg6[%c0_11, %c0_12], %13 {strides = array<i32>} : memref<16x128xf32, #tpu.memory_space<vmem>>, vector<16x128xf32>,
    return
  }
  func.func @transform_0(%arg0: i32) -> (i32, i32) {
    %c0_i32 = arith.constant 0 : i32
    %c0_i32_0 = arith.constant 0 : i32
    return %arg0, %c0_i32 : i32, i32
  }
  func.func @transform_1(%arg0: i32) -> (i32, i32) {
    %c0_i32 = arith.constant 0 : i32
    %c0_i32_0 = arith.constant 0 : i32
    %c0_i32_1 = arith.constant 0 : i32
    return %c0_i32, %c0_i32_0 : i32, i32
  }
  func.func @transform_2(%arg0: i32) -> (i32, i32) {
    %c0_i32 = arith.constant 0 : i32
    %c0_i32_0 = arith.constant 0 : i32
    %c0_i32_1 = arith.constant 0 : i32
    return %c0_i32, %c0_i32_0 : i32, i32
  }
  func.func @transform_3(%arg0: i32) -> (i32, i32) {
    %c0_i32 = arith.constant 0 : i32
    %c0_i32_0 = arith.constant 0 : i32
    %c0_i32_1 = arith.constant 0 : i32
    return %c0_i32, %c0_i32_0 : i32, i32
  }
  func.func @transform_4(%arg0: i32) -> (i32, i32) {
    %c0_i32 = arith.constant 0 : i32
    %c0_i32_0 = arith.constant 0 : i32
    %c0_i32_1 = arith.constant 0 : i32
    return %c0_i32, %c0_i32_0 : i32, i32
  }
  func.func @transform_5(%arg0: i32) -> (i32, i32) {
    %c0_i32 = arith.constant 0 : i32
    %c0_i32_0 = arith.constant 0 : i32
    return %arg0, %c0_i32 : i32, i32
  }
}

module attributes {stable_mosaic.version = 11 : i64} {
  func.func @_upmod_select_down_kernel(%arg0: i32, %arg1: memref<2x8x128xbf16, #tpu.memory_space<vmem>>, %arg2: memref<2x1x128xf32, #tpu.memory_space<vmem>>, %arg3: memref<128x256xbf16, #tpu.memory_space<vmem>>, %arg4: memref<1x128xf32, #tpu.memory_space<vmem>>, %arg5: memref<1x128xf32, #tpu.memory_space<vmem>>, %arg6: memref<128x128xbf16, #tpu.memory_space<vmem>>, %arg7: memref<1x128xf32, #tpu.memory_space<vmem>>, %arg8: memref<2x8x128xf32, #tpu.memory_space<vmem>>) attributes {dimension_semantics = [#tpu.dimension_semantics<parallel>], iteration_bounds = array<i64: 1>, scalar_prefetch = 0 : i64, scratch_operands = 0 : i64, tpu.core_type = #tpu.core_type<tc>, window_params = [{transform_indices = @transform_0, window_bounds = array<i64: 2, 8, 128>}, {transform_indices = @transform_1, window_bounds = array<i64: 2, 1, 128>}, {pipeline_mode = #tpu.pipeline_mode<synchronous>, transform_indices = @transform_2, window_bounds = array<i64: 128, 256>}, {pipeline_mode = #tpu.pipeline_mode<synchronous>, transform_indices = @transform_3, window_bounds = array<i64: 1, 128>}, {pipeline_mode = #tpu.pipeline_mode<synchronous>, transform_indices = @transform_4, window_bounds = array<i64: 1, 128>}, {pipeline_mode = #tpu.pipeline_mode<synchronous>, transform_indices = @transform_5, window_bounds = array<i64: 128, 128>}, {pipeline_mode = #tpu.pipeline_mode<synchronous>, transform_indices = @transform_6, window_bounds = array<i64: 1, 128>}, {transform_indices = @transform_7, window_bounds = array<i64: 2, 8, 128>}]} {
    %c0 = arith.constant 0 : index
    %c0_0 = arith.constant 0 : index
    %c0_1 = arith.constant 0 : index
    %0 = vector.load %arg1[%c0, %c0_0, %c0_1] : memref<2x8x128xbf16, #tpu.memory_space<vmem>>, vector<2x8x128xbf16>
    %1 = vector.shape_cast %0 : vector<2x8x128xbf16> to vector<16x128xbf16>
    %c0_2 = arith.constant 0 : index
    %c0_3 = arith.constant 0 : index
    %2 = vector.load %arg3[%c0_2, %c0_3] : memref<128x256xbf16, #tpu.memory_space<vmem>>, vector<128x256xbf16>
    %cst = arith.constant dense<0.000000e+00> : vector<16x256xf32>
    %3 = tpu.matmul %1, %2, %cst {dimension_numbers = #tpu.dot_dimension_numbers<[1], [0], [0], [1], [0, 0, 1, 1], [], []>} : vector<16x128xbf16>, vector<128x256xbf16>, vector<16x256xf32> -> vector<16x256xf32>
    %4 = vector.extract_strided_slice %3 {offsets = [0, 0], sizes = [16, 128], strides = [1, 1]} : vector<16x256xf32> to vector<16x128xf32>
    %5 = vector.shape_cast %4 : vector<16x128xf32> to vector<2x8x128xf32>
    %6 = vector.extract_strided_slice %3 {offsets = [0, 128], sizes = [16, 128], strides = [1, 1]} : vector<16x256xf32> to vector<16x128xf32>
    %7 = vector.shape_cast %6 : vector<16x128xf32> to vector<2x8x128xf32>
    %c0_4 = arith.constant 0 : index
    %c0_5 = arith.constant 0 : index
    %c0_6 = arith.constant 0 : index
    %8 = vector.load %arg2[%c0_4, %c0_5, %c0_6] : memref<2x1x128xf32, #tpu.memory_space<vmem>>, vector<2x1x128xf32>
    %cst_7 = arith.constant 5.000000e-01 : f32
    %9 = vector.broadcast %cst_7 : f32 to vector<2x1x128xf32>
    %10 = arith.cmpf ogt, %8, %9 : vector<2x1x128xf32>
    %11 = vector.shape_cast %10 : vector<2x1x128xi1> to vector<2x1x128xi1>
    %12 = vector.broadcast %11 : vector<2x1x128xi1> to vector<2x8x128xi1>
    %13 = arith.select %12, %7, %5 : vector<2x8x128xi1>, vector<2x8x128xf32>
    %c0_8 = arith.constant 0 : index
    %c0_9 = arith.constant 0 : index
    %14 = vector.load %arg5[%c0_8, %c0_9] : memref<1x128xf32, #tpu.memory_space<vmem>>, vector<1x128xf32>
    %15 = vector.shape_cast %14 : vector<1x128xf32> to vector<1x1x128xf32>
    %c0_10 = arith.constant 0 : index
    %c0_11 = arith.constant 0 : index
    %16 = vector.load %arg4[%c0_10, %c0_11] : memref<1x128xf32, #tpu.memory_space<vmem>>, vector<1x128xf32>
    %17 = vector.shape_cast %16 : vector<1x128xf32> to vector<1x1x128xf32>
    %18 = vector.shape_cast %15 : vector<1x1x128xf32> to vector<1x1x128xf32>
    %19 = vector.broadcast %18 : vector<1x1x128xf32> to vector<2x1x128xf32>
    %20 = vector.shape_cast %17 : vector<1x1x128xf32> to vector<1x1x128xf32>
    %21 = vector.broadcast %20 : vector<1x1x128xf32> to vector<2x1x128xf32>
    %22 = arith.select %10, %19, %21 : vector<2x1x128xi1>, vector<2x1x128xf32>
    %23 = vector.broadcast %22 : vector<2x1x128xf32> to vector<2x8x128xf32>
    %24 = arith.addf %13, %23 : vector<2x8x128xf32>
    %25 = arith.mulf %24, %24 : vector<2x8x128xf32>
    %26 = arith.mulf %24, %25 : vector<2x8x128xf32>
    %cst_12 = arith.constant 4.471500e-02 : f32
    %27 = vector.broadcast %cst_12 : f32 to vector<2x8x128xf32>
    %28 = arith.mulf %27, %26 : vector<2x8x128xf32>
    %29 = arith.addf %24, %28 : vector<2x8x128xf32>
    %cst_13 = arith.constant 0.797884583 : f32
    %30 = vector.broadcast %cst_13 : f32 to vector<2x8x128xf32>
    %31 = arith.mulf %30, %29 : vector<2x8x128xf32>
    %32 = math.tanh %31 : vector<2x8x128xf32>
    %cst_14 = arith.constant 1.000000e+00 : f32
    %33 = vector.broadcast %cst_14 : f32 to vector<2x8x128xf32>
    %34 = arith.addf %33, %32 : vector<2x8x128xf32>
    %cst_15 = arith.constant 5.000000e-01 : f32
    %35 = vector.broadcast %cst_15 : f32 to vector<2x8x128xf32>
    %36 = arith.mulf %35, %34 : vector<2x8x128xf32>
    %37 = arith.mulf %24, %36 : vector<2x8x128xf32>
    %38 = vector.shape_cast %37 : vector<2x8x128xf32> to vector<16x128xf32>
    %39 = arith.truncf %38 : vector<16x128xf32> to vector<16x128xbf16>
    %c0_16 = arith.constant 0 : index
    %c0_17 = arith.constant 0 : index
    %40 = vector.load %arg6[%c0_16, %c0_17] : memref<128x128xbf16, #tpu.memory_space<vmem>>, vector<128x128xbf16>
    %cst_18 = arith.constant dense<0.000000e+00> : vector<16x128xf32>
    %41 = tpu.matmul %39, %40, %cst_18 {dimension_numbers = #tpu.dot_dimension_numbers<[1], [0], [0], [1], [0, 0, 1, 1], [], []>} : vector<16x128xbf16>, vector<128x128xbf16>, vector<16x128xf32> -> vector<16x128xf32>
    %c0_19 = arith.constant 0 : index
    %c0_20 = arith.constant 0 : index
    %42 = vector.load %arg7[%c0_19, %c0_20] : memref<1x128xf32, #tpu.memory_space<vmem>>, vector<1x128xf32>
    %43 = vector.broadcast %42 : vector<1x128xf32> to vector<16x128xf32>
    %44 = arith.addf %41, %43 : vector<16x128xf32>
    %45 = vector.shape_cast %44 : vector<16x128xf32> to vector<2x8x128xf32>
    %c0_21 = arith.constant 0 : index
    %c0_22 = arith.constant 0 : index
    %c0_23 = arith.constant 0 : index
    %46 = vector.load %arg8[%c0_21, %c0_22, %c0_23] : memref<2x8x128xf32, #tpu.memory_space<vmem>>, vector<2x8x128xf32>
    tpu.vector_store %arg8[%c0_21, %c0_22, %c0_23], %45 {strides = array<i32>} : memref<2x8x128xf32, #tpu.memory_space<vmem>>, vector<2x8x128xf32>,
    return
  }
  func.func @transform_0(%arg0: i32) -> (i32, i32, i32) {
    %c0_i32 = arith.constant 0 : i32
    %c0_i32_0 = arith.constant 0 : i32
    %c0_i32_1 = arith.constant 0 : i32
    return %arg0, %c0_i32, %c0_i32_0 : i32, i32, i32
  }
  func.func @transform_1(%arg0: i32) -> (i32, i32, i32) {
    %c0_i32 = arith.constant 0 : i32
    %c0_i32_0 = arith.constant 0 : i32
    %c0_i32_1 = arith.constant 0 : i32
    return %arg0, %c0_i32, %c0_i32_0 : i32, i32, i32
  }
  func.func @transform_2(%arg0: i32) -> (i32, i32) {
    %c0_i32 = arith.constant 0 : i32
    %c0_i32_0 = arith.constant 0 : i32
    %c0_i32_1 = arith.constant 0 : i32
    return %c0_i32, %c0_i32_0 : i32, i32
  }
  func.func @transform_3(%arg0: i32) -> (i32, i32) {
    %c0_i32 = arith.constant 0 : i32
    %c0_i32_0 = arith.constant 0 : i32
    %c0_i32_1 = arith.constant 0 : i32
    return %c0_i32, %c0_i32_0 : i32, i32
  }
  func.func @transform_4(%arg0: i32) -> (i32, i32) {
    %c0_i32 = arith.constant 0 : i32
    %c0_i32_0 = arith.constant 0 : i32
    %c0_i32_1 = arith.constant 0 : i32
    return %c0_i32, %c0_i32_0 : i32, i32
  }
  func.func @transform_5(%arg0: i32) -> (i32, i32) {
    %c0_i32 = arith.constant 0 : i32
    %c0_i32_0 = arith.constant 0 : i32
    %c0_i32_1 = arith.constant 0 : i32
    return %c0_i32, %c0_i32_0 : i32, i32
  }
  func.func @transform_6(%arg0: i32) -> (i32, i32) {
    %c0_i32 = arith.constant 0 : i32
    %c0_i32_0 = arith.constant 0 : i32
    %c0_i32_1 = arith.constant 0 : i32
    return %c0_i32, %c0_i32_0 : i32, i32
  }
  func.func @transform_7(%arg0: i32) -> (i32, i32, i32) {
    %c0_i32 = arith.constant 0 : i32
    %c0_i32_0 = arith.constant 0 : i32
    %c0_i32_1 = arith.constant 0 : i32
    return %arg0, %c0_i32, %c0_i32_0 : i32, i32, i32
  }
}

</mosaic_0001>

<bundles_post_ra>
// kernel: praxis_scatter_forward.2
= control target key start
LH: loop header
LB: loop body
LE: loop exit
PB: predicated region body
PF: predicated region fallthrough
CT: control target
= control target key end

     0   :  { %10 = vsyncpa [#allocation3], 0  ;;  %s400_s18 = smov [#allocation2]   ;;  %s486_s0 = inlined_call_operand.vmem [shape: bf16[16,128], index: 0, kind: input, shape index: {}]   ;;  %s487_s1 = inlined_call_operand.vmem [shape: bf16[128,128], index: 1, kind: input, shape index: {}]   ;;  %s488_s2 = inlined_call_operand.vmem [shape: f32[1,128], index: 2, kind: input, shape index: {}]   ;;  %s489_s3 = inlined_call_operand.hbm [shape: bf16[128,128], index: 3, kind: input, shape index: {}]   ;;  %s490_s4 = inlined_call_operand.vmem [shape: f32[1,128], index: 4, kind: input, shape index: {}]   ;;  %s491_s5 = inlined_call_operand.vmem [shape: f32[16,128], index: 5, kind: output, shape index: {}]  }
   0x1   :  { %s22_s19 = sshll.u32 %s400_s18, 4  ;;  %s376_s22 = scalar_lea.hbm %s489_s3, 1024  ;;  %s23_s19 = int_to_ptr.vmem [resolvable:$true] %s22_s19 }
   0x2   :  { %p377_p0 = scmp.ne.s32.totalorder %s489_s3, %s376_s22  ;;  %p380_p1 = scmp.lt.u32.totalorder %s376_s22, %s489_s3 }
   0x4   :  { %p382_p2 = pnand %p380_p1, %p377_p0 }
   0x6   :  { %385 = shalt.err (!%p382_p2)
}
   0x7   :  { %s386_s27 = scalar_lea.vmem %s23_s19, 1024  ;;  %p391_p4 = scmp.lt.s32.totalorder %s23_s19, %s23_s19 }
   0x8   :  { %p387_p3 = scmp.ne.s32.totalorder %s23_s19, %s386_s27  ;;  %p392_p5 = scmp.lt.s32.totalorder %s386_s27, %s386_s27 }
   0xa   :  { %p393_p6 = por %p392_p5, %p391_p4 }
   0xc   :  { %p394_p7 = pnand %p393_p6, %p387_p3 }
   0xe   :  { %397 = shalt.err (!%p394_p7)
}
   0xf   :  { %s401_s28 = smov 64   ;;  %s402_s29 = smov 4  }
  0x10   :  { %28 = dma.hbm_to_vmem [thread:$0]  %s489_s3, 1024, %s23_s19, [#allocation3], %s401_s28, %s401_s28, %s402_s29  }
  0x11   :  { %398 = dma.done.wait [#allocation3], 1024  }
  0x12   :  { %399 = vsyncadd [#allocation3], 4294966272  ;;  %v403_v0 = vmov 0.0   ;;  %vm404_vm0 = vmmov 0   ;;  %v359_v1 = vld [vmem:[%s487_s1] sm:$0xff]   ;;  %v360_v2 = vld [vmem:[%s487_s1 + $0x8] sm:$0xff]  }
  0x13   :  { %314 = vmatprep.subr.bf16.mxu0 %v403_v0  ;;  %330 = vmatprep.mubr.msk.bf16.mxu0 %vm404_vm0, %v403_v0  ;;  %v361_v3 = vld [vmem:[%s487_s1 + $0x10] sm:$0xff]   ;;  %v368_v4 = vld [vmem:[#allocation2] sm:$0xff]   ;;  %v362_v5 = vld [vmem:[%s487_s1 + $0x18] sm:$0xff]  }
  0x14   :  { %334 = vmatprep.subr.bf16.mxu1 %v403_v0  ;;  %350 = vmatprep.mubr.msk.bf16.mxu1 %vm404_vm0, %v403_v0  ;;  %v369_v6 = vld [vmem:[#allocation2 + $0x8] sm:$0xff]   ;;  %v363_v7 = vld [vmem:[%s487_s1 + $0x20] sm:$0xff]   ;;  %v370_v8 = vld [vmem:[#allocation2 + $0x10] sm:$0xff]  }
  0x15   :  { %315 = vmatpush3.bf16.msra.mxu0 %v359_v1  ;;  %335 = vmatpush3.bf16.msra.mxu1 %v368_v4  ;;  %v364_v9 = vld [vmem:[%s487_s1 + $0x28] sm:$0xff]   ;;  %v371_v10 = vld [vmem:[#allocation2 + $0x18] sm:$0xff]   ;;  %v365_v11 = vld [vmem:[%s487_s1 + $0x30] sm:$0xff]  }
  0x16   :  { %316 = vmatprep.subr.bf16.mxu0 %v403_v0  ;;  %336 = vmatprep.subr.bf16.mxu1 %v403_v0  ;;  %v372_v12 = vld [vmem:[#allocation2 + $0x20] sm:$0xff]   ;;  %v366_v13 = vld [vmem:[%s487_s1 + $0x38] sm:$0xff]   ;;  %v373_v14 = vld [vmem:[#allocation2 + $0x28] sm:$0xff]  }
  0x17   :  { %v367_v15 = vld [vmem:[%s486_s0] sm:$0xff]   ;;  %v374_v16 = vld [vmem:[#allocation2 + $0x30] sm:$0xff]  }
  0x18   :  { %v375_v17 = vld [vmem:[#allocation2 + $0x38] sm:$0xff]  }
  0x19   :  { %317 = vmatpush3.bf16.msra.mxu0 %v360_v2  ;;  %337 = vmatpush3.bf16.msra.mxu1 %v369_v6  ;;  %v277_v18 = vld [vmem:[%s488_s2] ss:$0 sm:$0xff] }
  0x1a   :  { %318 = vmatprep.subr.bf16.mxu0 %v403_v0  ;;  %338 = vmatprep.subr.bf16.mxu1 %v403_v0  ;;  %v287_v28 = vld [vmem:[%s490_s4] ss:$0 sm:$0xff] }
  0x1d   :  { %319 = vmatpush3.bf16.msra.mxu0 %v361_v3  ;;  %339 = vmatpush3.bf16.msra.mxu1 %v370_v8 }
  0x1e   :  { %320 = vmatprep.subr.bf16.mxu0 %v403_v0  ;;  %340 = vmatprep.subr.bf16.mxu1 %v403_v0 }
  0x21   :  { %321 = vmatpush3.bf16.msra.mxu0 %v362_v5  ;;  %341 = vmatpush3.bf16.msra.mxu1 %v371_v10 }
  0x22   :  { %322 = vmatprep.subr.bf16.mxu0 %v403_v0  ;;  %342 = vmatprep.subr.bf16.mxu1 %v403_v0 }
  0x25   :  { %323 = vmatpush3.bf16.msra.mxu0 %v363_v7  ;;  %343 = vmatpush3.bf16.msra.mxu1 %v372_v12 }
  0x26   :  { %324 = vmatprep.subr.bf16.mxu0 %v403_v0  ;;  %344 = vmatprep.subr.bf16.mxu1 %v403_v0 }
  0x29   :  { %325 = vmatpush3.bf16.msra.mxu0 %v364_v9  ;;  %345 = vmatpush3.bf16.msra.mxu1 %v373_v14 }
  0x2a   :  { %326 = vmatprep.subr.bf16.mxu0 %v403_v0  ;;  %346 = vmatprep.subr.bf16.mxu1 %v403_v0 }
  0x2d   :  { %327 = vmatpush3.bf16.msra.mxu0 %v365_v11  ;;  %347 = vmatpush3.bf16.msra.mxu1 %v374_v16 }
  0x2e   :  { %328 = vmatprep.subr.bf16.mxu0 %v403_v0  ;;  %348 = vmatprep.subr.bf16.mxu1 %v403_v0 }
  0x31   :  { %329 = vmatpush3.bf16.msra.mxu0 %v366_v13  ;;  %349 = vmatpush3.bf16.msra.mxu1 %v375_v17 }
  0x34   :  { %331 = vmatmul.mubr.bf16.vlgmr.msra.gmra.mrb[0].mxu0 %v367_v15 }
 0x107   :  { %v148_v19 = vpop.f32.mrb[0].mxu0 }
 0x108   :  { %v149_v20 = vadd.f32 %v277_v18, %v148_v19  ;;  %v332_v21 = vpop.f32.mrb[1].mxu0 }
 0x109   :  { %v151_v22 = vpop.f32.mrb[2].mxu0 }
 0x10a   :  { %v152_v23 = vadd.f32 %v277_v18, %v151_v22  ;;  %v333_v24 = vpop.f32.mrb[3].mxu0  ;;  %v155_v25 = vmax.f32 %v149_v20, 0.0 }
 0x10c   :  { %v156_v26 = vmax.f32 %v152_v23, 0.0 }
 0x10e   :  { %v157_v27 = vpack.c.bf16 %v156_v26, %v155_v25 }
 0x110   :  { %351 = vmatmul.mubr.bf16.vlgmr.msra.gmra.mrb[0].mxu1 %v157_v27 }
 0x1e3   :  { %v263_v29 = vpop.f32.mrb[0].mxu1 }
 0x1e4   :  { %v264_v30 = vadd.f32 %v287_v28, %v263_v29  ;;  %v352_v31 = vpop.f32.mrb[1].mxu1 }
 0x1e5   :  { %v266_v32 = vpop.f32.mrb[2].mxu1 }
 0x1e6   :  { %270 = vst [vmem:[%s491_s5] sm:$0xff] %v264_v30  ;;  %v267_v33 = vadd.f32 %v287_v28, %v266_v32  ;;  %v353_v34 = vpop.f32.mrb[3].mxu1 }
 0x1e8   :  { %271 = vst [vmem:[%s491_s5 + $0x8] sm:$0xff] %v267_v33 }
 0x1e9   :  { %276 = vsyncpa [#allocation3], 1 }

// kernel: praxis_scatter_forward.3
= control target key start
LH: loop header
LB: loop body
LE: loop exit
PB: predicated region body
PF: predicated region fallthrough
CT: control target
= control target key end

     0   :  { %v482_v2 = vmov 0   ;;  %s633_s0 = inlined_call_operand.vmem [shape: bf16[2,8,128], index: 0, kind: input, shape index: {}]   ;;  %s634_s1 = inlined_call_operand.vmem [shape: f32[2,1,128], index: 1, kind: input, shape index: {}]   ;;  %s635_s2 = inlined_call_operand.vmem [shape: bf16[128,256], index: 2, kind: input, shape index: {}]   ;;  %s636_s3 = inlined_call_operand.vmem [shape: f32[1,128], index: 3, kind: input, shape index: {}]   ;;  %s637_s4 = inlined_call_operand.vmem [shape: f32[1,128], index: 4, kind: input, shape index: {}]   ;;  %s638_s5 = inlined_call_operand.vmem [shape: bf16[128,128], index: 5, kind: input, shape index: {}]   ;;  %s639_s6 = inlined_call_operand.vmem [shape: f32[1,128], index: 6, kind: input, shape index: {}]   ;;  %s640_s7 = inlined_call_operand.hbm [shape: f32[2,8,128], index: 7, kind: output, shape index: {}]  }
   0x1   :  { %v421_v0 = vld [vmem:[%s635_s2 + $0x4] ss:$8 sps:$4 sm:$0xff]   ;;  %v423_v1 = vld [vmem:[%s635_s2] ss:$8 sps:$4 sm:$0xff]   ;;  %164 = vmatprep.mubr.bf16.mxu0 %v482_v2  ;;  %v424_v3 = vld [vmem:[%s635_s2 + $0x14] ss:$8 sps:$4 sm:$0xff]  }
   0x2   :  { %132 = vmatprep.subr.bf16.mxu0 %v421_v0  ;;  %v426_v4 = vld [vmem:[%s635_s2 + $0x10] ss:$8 sps:$4 sm:$0xff]   ;;  %v427_v5 = vld [vmem:[%s635_s2 + $0x24] ss:$8 sps:$4 sm:$0xff]   ;;  %v429_v6 = vld [vmem:[%s635_s2 + $0x20] ss:$8 sps:$4 sm:$0xff]  }
   0x3   :  { %133 = vmatpush1.bf16.msra.mxu0 %v423_v1  ;;  %v430_v7 = vld [vmem:[%s635_s2 + $0x34] ss:$8 sps:$4 sm:$0xff]   ;;  %v432_v8 = vld [vmem:[%s635_s2 + $0x30] ss:$8 sps:$4 sm:$0xff]   ;;  %v433_v9 = vld [vmem:[%s635_s2 + $0x44] ss:$8 sps:$4 sm:$0xff]  }
   0x4   :  { %134 = vmatprep.subr.bf16.mxu0 %v424_v3  ;;  %v435_v10 = vld [vmem:[%s635_s2 + $0x40] ss:$8 sps:$4 sm:$0xff]   ;;  %v436_v11 = vld [vmem:[%s635_s2 + $0x54] ss:$8 sps:$4 sm:$0xff]  }
   0x7   :  { %135 = vmatpush1.bf16.msra.mxu0 %v426_v4 }
   0x8   :  { %136 = vmatprep.subr.bf16.mxu0 %v427_v5 }
   0xb   :  { %137 = vmatpush1.bf16.msra.mxu0 %v429_v6 }
   0xc   :  { %138 = vmatprep.subr.bf16.mxu0 %v430_v7 }
   0xf   :  { %139 = vmatpush1.bf16.msra.mxu0 %v432_v8 }
  0x10   :  { %140 = vmatprep.subr.bf16.mxu0 %v433_v9 }
  0x11   :  { %12 = vsyncpa [#allocation3], 0  ;;  %v438_v12 = vld [vmem:[%s635_s2 + $0x50] ss:$8 sps:$4 sm:$0xff]   ;;  %v439_v13 = vld [vmem:[%s635_s2 + $0x64] ss:$8 sps:$4 sm:$0xff]   ;;  %v181_v27 = vlaneseq }
  0x12   :  { %v441_v14 = vld [vmem:[%s635_s2 + $0x60] ss:$8 sps:$4 sm:$0xff]   ;;  %v442_v15 = vld [vmem:[%s635_s2 + $0x74] ss:$8 sps:$4 sm:$0xff]   ;;  %v444_v16 = vld [vmem:[%s635_s2 + $0x70] ss:$8 sps:$4 sm:$0xff]  }
  0x13   :  { %141 = vmatpush1.bf16.msra.mxu0 %v435_v10  ;;  %v445_v17 = vld [vmem:[%s633_s0] sm:$0xff]   ;;  %v483_v19 = vmov 0.0   ;;  %v447_v20 = vld [vmem:[%s638_s5 + $0x8] sm:$0xff]   ;;  %v448_v21 = vld [vmem:[%s638_s5 + $0x10] sm:$0xff]   ;;  %vm484_vm0 = vmmov 0   ;;  %v182_v29 = vshrl.u32 %v181_v27, 7 }
  0x14   :  { %142 = vmatprep.subr.bf16.mxu0 %v436_v11  ;;  %v446_v18 = vld [vmem:[%s638_s5] sm:$0xff]   ;;  %395 = vmatprep.subr.bf16.mxu1 %v483_v19  ;;  %v449_v22 = vld [vmem:[%s638_s5 + $0x18] sm:$0xff]   ;;  %v451_v24 = vld [vmem:[%s638_s5 + $0x28] sm:$0xff]  }
  0x15   :  { %396 = vmatpush3.bf16.msra.mxu1 %v446_v18  ;;  %411 = vmatprep.mubr.msk.bf16.mxu1 %vm484_vm0, %v483_v19  ;;  %v450_v23 = vld [vmem:[%s638_s5 + $0x20] sm:$0xff]   ;;  %v452_v25 = vld [vmem:[%s638_s5 + $0x30] sm:$0xff]   ;;  %v453_v26 = vld [vmem:[%s638_s5 + $0x38] sm:$0xff]   ;;  %v183_v31 = vsub.s32 0, %v182_v29 }
  0x16   :  { %397 = vmatprep.subr.bf16.mxu1 %v483_v19  ;;  %v175_v28 = vld [vmem:[%s634_s1] sm:$0x1]  ;;  %v176_v30 = vld [vmem:[%s634_s1 + $0x1] sm:$0x1] }
  0x17   :  { %143 = vmatpush1.bf16.msra.mxu0 %v438_v12  ;;  %vm177_vm1 = vcmp.gt.f32.partialorder %v175_v28, 0.5  ;;  %vm178_vm2 = vcmp.gt.f32.partialorder %v176_v30, 0.5  ;;  %v193_v33 = vld [vmem:[%s637_s4] sm:$0x1]  ;;  %s485_s4 = smov [#allocation2]  }
  0x18   :  { %144 = vmatprep.subr.bf16.mxu0 %v439_v13  ;;  %v179_v32 = vsel %vm177_vm1, 1, %v482_v2  ;;  %v194_v34 = vld [vmem:[%s636_s3] sm:$0x1]  ;;  %v180_v35 = vsel %vm178_vm2, 1, %v482_v2  ;;  %s349_s10 = sshll.u32 %s485_s4, 4  ;;  %s350_s10 = int_to_ptr.vmem [resolvable:$true] %s349_s10 }
  0x19   :  { %398 = vmatpush3.bf16.msra.mxu1 %v447_v20  ;;  %v184_v36 = vrot.slane %v179_v32, %v183_v31  ;;  %v195_v37 = vsel %vm177_vm1, %v193_v33, %v194_v34  ;;  %v188_v38 = vrot.slane %v180_v35, %v183_v31  ;;  %v196_v39 = vsel %vm178_vm2, %v193_v33, %v194_v34  ;;  %v377_v5 = vld [vmem:[%s639_s6] ss:$0 sm:$0xff]  ;;  %s458_s11 = scalar_lea.vmem %s350_s10, 256  ;;  %p463_p1 = scmp.lt.s32.totalorder %s350_s10, %s350_s10 }
  0x1a   :  { %399 = vmatprep.subr.bf16.mxu1 %v483_v19  ;;  %v202_v40 = vrot.slane %v195_v37, %v183_v31  ;;  %v206_v43 = vrot.slane %v196_v39, %v183_v31  ;;  %p459_p0 = scmp.ne.s32.totalorder %s350_s10, %s458_s11  ;;  %p464_p2 = scmp.lt.s32.totalorder %s458_s11, %s458_s11 }
  0x1b   :  { %145 = vmatpush1.bf16.msra.mxu0 %v441_v14  ;;  %vm189_vm3 = vcmp.eq.s32.totalorder %v184_v36, 1  ;;  %vm190_vm4 = vcmp.eq.s32.totalorder %v188_v38, 1 }
  0x1c   :  { %146 = vmatprep.subr.bf16.mxu0 %v442_v15  ;;  %p465_p3 = por %p464_p2, %p463_p1 }
  0x1d   :  { %400 = vmatpush3.bf16.msra.mxu1 %v448_v21 }
  0x1e   :  { %401 = vmatprep.subr.bf16.mxu1 %v483_v19  ;;  %p466_p4 = pnand %p465_p3, %p459_p0 }
  0x1f   :  { %147 = vmatpush1.bf16.msra.mxu0 %v444_v16 }
  0x21   :  { %402 = vmatpush3.bf16.msra.mxu1 %v449_v22 }
  0x22   :  { %165 = vmatmul.mubr.bf16.vlgmr.msra.gmra.mrb[0].mxu0 %v445_v17  ;;  %403 = vmatprep.subr.bf16.mxu1 %v483_v19 }
  0x25   :  { %404 = vmatpush3.bf16.msra.mxu1 %v450_v23 }
  0x26   :  { %405 = vmatprep.subr.bf16.mxu1 %v483_v19 }
  0x29   :  { %406 = vmatpush3.bf16.msra.mxu1 %v451_v24 }
  0x2a   :  { %407 = vmatprep.subr.bf16.mxu1 %v483_v19 }
  0x2d   :  { %408 = vmatpush3.bf16.msra.mxu1 %v452_v25 }
  0x2e   :  { %409 = vmatprep.subr.bf16.mxu1 %v483_v19 }
  0x31   :  { %410 = vmatpush3.bf16.msra.mxu1 %v453_v26 }
  0xf5   :  { %v166_v41 = vpop.f32.mrb[0].mxu0 }
  0xf6   :  { %v168_v42 = vpop.f32.mrb[1].mxu0 }
  0xf7   :  { %v191_v44 = vsel %vm189_vm3, %v168_v42, %v166_v41  ;;  %v170_v45 = vpop.f32.mrb[2].mxu0 }
  0xf8   :  { %v209_v46 = vadd.f32 %v202_v40, %v191_v44  ;;  %v172_v47 = vpop.f32.mrb[3].mxu0 }
  0xf9   :  { %v192_v48 = vsel %vm190_vm4, %v172_v47, %v170_v45 }
  0xfa   :  { %v211_v49 = vmul.f32 %v209_v46, %v209_v46  ;;  %v210_v50 = vadd.f32 %v206_v43, %v192_v48 }
  0xfc   :  { %v213_v51 = vmul.f32 %v211_v49, %v209_v46  ;;  %v212_v52 = vmul.f32 %v210_v50, %v210_v50 }
  0xfe   :  { %v215_v53 = vmul.f32 0.044715, %v213_v51  ;;  %v214_v54 = vmul.f32 %v212_v52, %v210_v50 }
 0x100   :  { %v217_v55 = vadd.f32 %v215_v53, %v209_v46  ;;  %v216_v56 = vmul.f32 0.044715, %v214_v54 }
 0x102   :  { %v219_v57 = vmul.f32 0.7978846, %v217_v55  ;;  %v218_v58 = vadd.f32 %v216_v56, %v210_v50 }
 0x104   :  { %v220_v59 = vmul.f32 0.7978846, %v218_v58  ;;  %454 = vtanh.f32 %v219_v57 }
 0x106   :  { %456 = vtanh.f32 %v220_v59 }
 0x10e   :  { %v455_v60 = vpop.eup %454 }
 0x10f   :  { %v223_v61 = vadd.f32 1.0, %v455_v60 }
 0x110   :  { %v457_v62 = vpop.eup %456 }
 0x111   :  { %v224_v63 = vadd.f32 1.0, %v457_v62  ;;  %v225_v0 = vmul.f32 0.5, %v223_v61 }
 0x113   :  { %v226_v1 = vmul.f32 0.5, %v224_v63  ;;  %v227_v2 = vmul.f32 %v225_v0, %v209_v46 }
 0x115   :  { %v228_v3 = vmul.f32 %v226_v1, %v210_v50 }
 0x117   :  { %v229_v4 = vpack.c.bf16 %v228_v3, %v227_v2 }
 0x119   :  { %412 = vmatmul.mubr.bf16.vlgmr.msra.gmra.mrb[0].mxu1 %v229_v4 }
 0x1ec   :  { %v335_v6 = vpop.f32.mrb[0].mxu1 }
 0x1ed   :  { %v336_v7 = vadd.f32 %v377_v5, %v335_v6  ;;  %v413_v8 = vpop.f32.mrb[1].mxu1 }
 0x1ee   :  { %v338_v9 = vpop.f32.mrb[2].mxu1 }
 0x1ef   :  { %342 = vst [vmem:[#allocation2] sm:$0xff] %v336_v7  ;;  %v339_v10 = vadd.f32 %v377_v5, %v338_v9  ;;  %v414_v11 = vpop.f32.mrb[3].mxu1 }
 0x1f1   :  { %343 = vst [vmem:[#allocation2 + $0x8] sm:$0xff] %v339_v10 }
 0x1f2   :  { %469 = shalt.err (!%p466_p4)
}
 0x1f3   :  { %s470_s13 = scalar_lea.hbm %s640_s7, 256 }
 0x1f4   :  { %p471_p5 = scmp.ne.s32.totalorder %s640_s7, %s470_s13  ;;  %p474_p6 = scmp.lt.u32.totalorder %s470_s13, %s640_s7 }
 0x1f6   :  { %p476_p7 = pnand %p474_p6, %p471_p5 }
 0x1f8   :  { %479 = shalt.err (!%p476_p7)
}
 0x1f9   :  { %s486_s0 = smov 128   ;;  %s487_s17 = smov 8  }
 0x1fa   :  { %355 = dma.vmem_to_hbm [thread:$0]  %s350_s10, 256, %s640_s7, [#allocation3], %s486_s0, %s486_s0, %s487_s17  }
 0x1fb   :  { %480 = dma.done.wait [#allocation3], 256  }
 0x1fc   :  { %481 = vsyncadd [#allocation3], 4294967040 }
 0x1fd   :  { %359 = vsyncpa [#allocation3], 1 }

</bundles_post_ra>
